<compile_context>
chip_gen: v5e
topology: v5e:2x2
jax: 0.10.0
libtpu: 0.0.40
codegen_flags: <defaults>
</compile_context>

<pallas_src>
import jax
import jax.numpy as jnp
from jax.experimental import pallas as pl
from jax.experimental.pallas import tpu as pltpu

HIDDEN = 150        # hidden width hard-coded in the PyTorch module
HIDDEN_PAD = 256    # zero-padded hidden width: multiple of 128 lanes / 8 sublanes
OUT_PAD = 128       # lane-dense padded output width (real N_ACTIONS sliced out)


def _net_kernel(x_ref, w1_ref, b1_ref, w2_ref, b2_ref, out_ref):
    """Fused MLP forward on one batch tile: relu(x @ W1 + b1) @ W2 + b2.

    x/W1/W2 are bf16 (MXU-native, f32 accumulation); biases, relu and the final
    store are f32.  All operands are (8,128)-aligned single VMEM blocks.
    """
    h = jnp.dot(x_ref[...], w1_ref[...],
                preferred_element_type=jnp.float32)          # (TB, HIDDEN_PAD) f32
    h = jnp.maximum(h + b1_ref[...], 0.0)                    # bias + relu on VPU (f32)
    h = h.astype(w2_ref.dtype)                               # bf16 back into the MXU
    y = jnp.dot(h, w2_ref[...],
                preferred_element_type=jnp.float32)          # (TB, OUT_PAD) f32
    out_ref[...] = (y + b2_ref[...]).astype(out_ref.dtype)   # lane-dense unmasked store


def init_params(key, n_states, n_actions):
    """Deterministic parameter init matching the PyTorch module's __init__.

    Returns logical-size (unpadded) params; weights stored (in, out).
    """
    k1, k2, k3, k4 = jax.random.split(key, 4)
    w1 = (0.1 * jax.random.normal(k1, (n_states, HIDDEN))).astype(jnp.float32)
    bound1 = 1.0 / jnp.sqrt(n_states)
    b1 = jax.random.uniform(k2, (HIDDEN,), minval=-bound1,
                            maxval=bound1).astype(jnp.float32)
    w2 = (0.1 * jax.random.normal(k3, (HIDDEN, n_actions))).astype(jnp.float32)
    bound2 = 1.0 / jnp.sqrt(HIDDEN)
    b2 = jax.random.uniform(k4, (n_actions,), minval=-bound2,
                            maxval=bound2).astype(jnp.float32)
    return w1, b1, w2, b2


def pad_params(w1, b1, w2, b2):
    """Zero-pad params to (8,128)-aligned shapes; cast matmul weights to bf16."""
    n_states = w1.shape[0]
    n_actions = w2.shape[1]
    w1p = jnp.zeros((n_states, HIDDEN_PAD), jnp.float32).at[:, :HIDDEN].set(w1)
    b1p = jnp.zeros((1, HIDDEN_PAD), jnp.float32).at[0, :HIDDEN].set(b1)
    w2p = jnp.zeros((HIDDEN_PAD, OUT_PAD), jnp.float32).at[:HIDDEN, :n_actions].set(w2)
    b2p = jnp.zeros((1, OUT_PAD), jnp.float32).at[0, :n_actions].set(b2)
    return (w1p.astype(jnp.bfloat16), b1p,
            w2p.astype(jnp.bfloat16), b2p)


def net_forward(x, padded_params, n_actions, *, batch_tile=1024):
    """Pallas forward.  x: (B, N_STATES) f32 -> (B, n_actions) f32.

    The batch is tiled over a 1-D grid; weights/biases use constant index_maps
    so they are DMA'd once and stay VMEM-resident across all grid steps.
    """
    w1p, b1p, w2p, b2p = padded_params
    B, n_states = x.shape

    # Sublane-aligned batch tile (multiple of 8), capped by the requested tile.
    b_round = ((B + 7) // 8) * 8
    tb = min(((batch_tile + 7) // 8) * 8, b_round)
    b_pad = ((B + tb - 1) // tb) * tb

    xp = x
    if b_pad != B:
        xp = jnp.zeros((b_pad, n_states), x.dtype).at[:B].set(x)
    xp = xp.astype(jnp.bfloat16)

    grid = (b_pad // tb,)
    out_padded = pl.pallas_call(
        _net_kernel,
        out_shape=jax.ShapeDtypeStruct((b_pad, OUT_PAD), jnp.float32),
        grid_spec=pltpu.PrefetchScalarGridSpec(
            num_scalar_prefetch=0,
            grid=grid,
            in_specs=[
                pl.BlockSpec((tb, n_states), lambda i: (i, 0)),          # x tile streams
                pl.BlockSpec((n_states, HIDDEN_PAD), lambda i: (0, 0)),  # W1 resident
                pl.BlockSpec((1, HIDDEN_PAD), lambda i: (0, 0)),         # b1 resident
                pl.BlockSpec((HIDDEN_PAD, OUT_PAD), lambda i: (0, 0)),   # W2 resident
                pl.BlockSpec((1, OUT_PAD), lambda i: (0, 0)),            # b2 resident
            ],
            out_specs=pl.BlockSpec((tb, OUT_PAD), lambda i: (i, 0)),
        ),
        compiler_params=pltpu.CompilerParams(
            dimension_semantics=("parallel",)),   # v7x: shard batch across both TCs
    )(xp, w1p, b1p, w2p, b2p)

    return out_padded[:B, :n_actions]


def reference_forward_bf16(x, w1, b1, w2, b2):
    """Pure-JAX reference using the same bf16-in / f32-accumulate path."""
    h = jnp.dot(x.astype(jnp.bfloat16), w1.astype(jnp.bfloat16),
                preferred_element_type=jnp.float32)
    h = jnp.maximum(h + b1, 0.0)
    y = jnp.dot(h.astype(jnp.bfloat16), w2.astype(jnp.bfloat16),
                preferred_element_type=jnp.float32)
    return y + b2


def reference_forward_f32(x, w1, b1, w2, b2):
    """Full-precision reference (semantics of the PyTorch module)."""
    h = jnp.maximum(x @ w1 + b1, 0.0)
    return h @ w2 + b2


if __name__ == "__main__":
    key = jax.random.PRNGKey(0)
    kx, kp, kx2 = jax.random.split(key, 3)

    # Small shapes consistent with the DQN module: 8-dim state, 4 discrete actions.
    B, N_STATES, N_ACTIONS = 2, 8, 4

    w1, b1, w2, b2 = init_params(kp, N_STATES, N_ACTIONS)
    padded = pad_params(w1, b1, w2, b2)

    # --- run 1: tiny batch (single grid step, batch padded to one 8-row tile) ---
    x = jax.random.normal(kx, (B, N_STATES), dtype=jnp.float32)
    out = jax.block_until_ready(net_forward(x, padded, N_ACTIONS))
    assert out.shape == (B, N_ACTIONS)

    ref_bf16 = reference_forward_bf16(x, w1, b1, w2, b2)
    ref_f32 = reference_forward_f32(x, w1, b1, w2, b2)
    assert jnp.allclose(out, ref_bf16, atol=1e-4, rtol=1e-4), "mismatch vs bf16 reference"
    assert jnp.allclose(out, ref_f32, atol=5e-2, rtol=5e-2), "mismatch vs f32 reference"

    # --- run 2: exercise the batch grid + padding/slicing path (3 grid steps) ---
    B2 = 40
    x2 = jax.random.normal(kx2, (B2, N_STATES), dtype=jnp.float32)
    out2 = jax.block_until_ready(net_forward(x2, padded, N_ACTIONS, batch_tile=16))
    assert out2.shape == (B2, N_ACTIONS)
    ref2 = reference_forward_bf16(x2, w1, b1, w2, b2)
    assert jnp.allclose(out2, ref2, atol=1e-4, rtol=1e-4), "mismatch vs reference (gridded)"

    print("KERNEL_OK")
</pallas_src>

<mosaic_0001>
module attributes {stable_mosaic.version = 11 : i64} {
  func.func @_net_kernel(%arg0: i32, %arg1: memref<8x8xbf16, #tpu.memory_space<vmem>>, %arg2: memref<8x256xbf16, #tpu.memory_space<vmem>>, %arg3: memref<1x256xf32, #tpu.memory_space<vmem>>, %arg4: memref<256x128xbf16, #tpu.memory_space<vmem>>, %arg5: memref<1x128xf32, #tpu.memory_space<vmem>>, %arg6: memref<8x128xf32, #tpu.memory_space<vmem>>) attributes {dimension_semantics = [#tpu.dimension_semantics<parallel>], iteration_bounds = array<i64: 1>, scalar_prefetch = 0 : i64, scratch_operands = 0 : i64, tpu.core_type = #tpu.core_type<tc>, window_params = [{transform_indices = @transform_0, window_bounds = array<i64: 8, 8>}, {pipeline_mode = #tpu.pipeline_mode<synchronous>, transform_indices = @transform_1, window_bounds = array<i64: 8, 256>}, {pipeline_mode = #tpu.pipeline_mode<synchronous>, transform_indices = @transform_2, window_bounds = array<i64: 1, 256>}, {pipeline_mode = #tpu.pipeline_mode<synchronous>, transform_indices = @transform_3, window_bounds = array<i64: 256, 128>}, {pipeline_mode = #tpu.pipeline_mode<synchronous>, transform_indices = @transform_4, window_bounds = array<i64: 1, 128>}, {transform_indices = @transform_5, window_bounds = array<i64: 8, 128>}]} {
    %c0 = arith.constant 0 : index
    %c0_0 = arith.constant 0 : index
    %0 = vector.load %arg1[%c0, %c0_0] : memref<8x8xbf16, #tpu.memory_space<vmem>>, vector<8x8xbf16>
    %c0_1 = arith.constant 0 : index
    %c0_2 = arith.constant 0 : index
    %1 = vector.load %arg2[%c0_1, %c0_2] : memref<8x256xbf16, #tpu.memory_space<vmem>>, vector<8x256xbf16>
    %cst = arith.constant dense<0.000000e+00> : vector<8x256xf32>
    %2 = tpu.matmul %0, %1, %cst {dimension_numbers = #tpu.dot_dimension_numbers<[1], [0], [0], [1], [0, 0, 1, 1], [], []>} : vector<8x8xbf16>, vector<8x256xbf16>, vector<8x256xf32> -> vector<8x256xf32>
    %c0_3 = arith.constant 0 : index
    %c0_4 = arith.constant 0 : index
    %3 = vector.load %arg3[%c0_3, %c0_4] : memref<1x256xf32, #tpu.memory_space<vmem>>, vector<1x256xf32>
    %4 = vector.broadcast %3 : vector<1x256xf32> to vector<8x256xf32>
    %5 = arith.addf %2, %4 : vector<8x256xf32>
    %cst_5 = arith.constant 0.000000e+00 : f32
    %6 = vector.broadcast %cst_5 : f32 to vector<8x256xf32>
    %7 = arith.maximumf %5, %6 : vector<8x256xf32>
    %8 = arith.truncf %7 : vector<8x256xf32> to vector<8x256xbf16>
    %c0_6 = arith.constant 0 : index
    %c0_7 = arith.constant 0 : index
    %9 = vector.load %arg4[%c0_6, %c0_7] : memref<256x128xbf16, #tpu.memory_space<vmem>>, vector<256x128xbf16>
    %cst_8 = arith.constant dense<0.000000e+00> : vector<8x128xf32>
    %10 = tpu.matmul %8, %9, %cst_8 {dimension_numbers = #tpu.dot_dimension_numbers<[1], [0], [0], [1], [0, 0, 1, 1], [], []>} : vector<8x256xbf16>, vector<256x128xbf16>, vector<8x128xf32> -> vector<8x128xf32>
    %c0_9 = arith.constant 0 : index
    %c0_10 = arith.constant 0 : index
    %11 = vector.load %arg5[%c0_9, %c0_10] : memref<1x128xf32, #tpu.memory_space<vmem>>, vector<1x128xf32>
    %12 = vector.broadcast %11 : vector<1x128xf32> to vector<8x128xf32>
    %13 = arith.addf %10, %12 : vector<8x128xf32>
    %c0_11 = arith.constant 0 : index
    %c0_12 = arith.constant 0 : index
    %14 = vector.load %arg6[%c0_11, %c0_12] : memref<8x128xf32, #tpu.memory_space<vmem>>, vector<8x128xf32>
    tpu.vector_store %arg6[%c0_11, %c0_12], %13 {strides = array<i32>} : memref<8x128xf32, #tpu.memory_space<vmem>>, vector<8x128xf32>,
    return
  }
  func.func @transform_0(%arg0: i32) -> (i32, i32) {
    %c0_i32 = arith.constant 0 : i32
    %c0_i32_0 = arith.constant 0 : i32
    return %arg0, %c0_i32 : i32, i32
  }
  func.func @transform_1(%arg0: i32) -> (i32, i32) {
    %c0_i32 = arith.constant 0 : i32
    %c0_i32_0 = arith.constant 0 : i32
    %c0_i32_1 = arith.constant 0 : i32
    return %c0_i32, %c0_i32_0 : i32, i32
  }
  func.func @transform_2(%arg0: i32) -> (i32, i32) {
    %c0_i32 = arith.constant 0 : i32
    %c0_i32_0 = arith.constant 0 : i32
    %c0_i32_1 = arith.constant 0 : i32
    return %c0_i32, %c0_i32_0 : i32, i32
  }
  func.func @transform_3(%arg0: i32) -> (i32, i32) {
    %c0_i32 = arith.constant 0 : i32
    %c0_i32_0 = arith.constant 0 : i32
    %c0_i32_1 = arith.constant 0 : i32
    return %c0_i32, %c0_i32_0 : i32, i32
  }
  func.func @transform_4(%arg0: i32) -> (i32, i32) {
    %c0_i32 = arith.constant 0 : i32
    %c0_i32_0 = arith.constant 0 : i32
    %c0_i32_1 = arith.constant 0 : i32
    return %c0_i32, %c0_i32_0 : i32, i32
  }
  func.func @transform_5(%arg0: i32) -> (i32, i32) {
    %c0_i32 = arith.constant 0 : i32
    %c0_i32_0 = arith.constant 0 : i32
    return %arg0, %c0_i32 : i32, i32
  }
}

</mosaic_0001>

<bundles_post_ra>
// kernel: tpu_custom_call.1
= control target key start
LH: loop header
LB: loop body
LE: loop exit
PB: predicated region body
PF: predicated region fallthrough
CT: control target
= control target key end

     0   :  { %10 = vsyncpa [#allocation3], 0  ;;  %s584_s0 = inlined_call_operand.hbm [shape: bf16[8,8], index: 0, kind: input, shape index: {}]   ;;  %s585_s1 = inlined_call_operand.hbm [shape: bf16[8,256], index: 1, kind: input, shape index: {}]   ;;  %s586_s2 = inlined_call_operand.hbm [shape: f32[1,256], index: 2, kind: input, shape index: {}]   ;;  %s587_s3 = inlined_call_operand.hbm [shape: bf16[256,128], index: 3, kind: input, shape index: {}]   ;;  %s588_s4 = inlined_call_operand.vmem [shape: f32[1,128], index: 4, kind: input, shape index: {}]   ;;  %s589_s5 = inlined_call_operand.hbm [shape: f32[8,128], index: 5, kind: output, shape index: {}]  }
   0x1   :  { %11 = vsyncpa [#allocation6], 0 }
   0x2   :  { %12 = vsyncpa [#allocation9], 0  ;;  %s30_s20 = sshll.u32 %s585_s1, 4  ;;  %s31_s20 = int_to_ptr.hbm [resolvable:$true] %s30_s20 }
   0x3   :  { %13 = vsyncpa [#allocation4], 0  ;;  %s529_s21 = smov [#allocation5]   ;;  %s19_s25 = sshll.u32 %s584_s0, 4  ;;  %s20_s25 = int_to_ptr.hbm [resolvable:$true] %s19_s25 }
   0x4   :  { %s32_s22 = sshll.u32 %s529_s21, 4  ;;  %s530_s26 = smov [#allocation2]   ;;  %s33_s22 = int_to_ptr.vmem [resolvable:$true] %s32_s22 }
   0x5   :  { %35 = dma.hbm_to_vmem [thread:$0]  %s31_s20, 128, %s33_s22, [#allocation6]  }
   0x6   :  { %s21_s27 = sshll.u32 %s530_s26, 4  ;;  %s41_s30 = sshll.u32 %s586_s2, 4  ;;  %s22_s27 = int_to_ptr.vmem [resolvable:$true] %s21_s27  ;;  %s42_s30 = int_to_ptr.hbm [resolvable:$true] %s41_s30 }
   0x7   :  { %24 = dma.hbm_to_vmem [thread:$0]  %s20_s25, 64, %s22_s27, [#allocation3]  }
   0x8   :  { %s51_s7 = sshll.u32 %s587_s3, 4  ;;  %s531_s8 = smov [#allocation7]   ;;  %s52_s7 = int_to_ptr.hbm [resolvable:$true] %s51_s7 }
   0x9   :  { %s43_s9 = sshll.u32 %s531_s8, 4  ;;  %s532_s0 = smov [#allocation8]   ;;  %s44_s9 = int_to_ptr.vmem [resolvable:$true] %s43_s9 }
   0xa   :  { %46 = dma.hbm_to_vmem [thread:$0]  %s42_s30, 32, %s44_s9, [#allocation6]  }
   0xb   :  { %s53_s10 = sshll.u32 %s532_s0, 4  ;;  %s533_s11 = smov 64   ;;  %s54_s10 = int_to_ptr.vmem [resolvable:$true] %s53_s10 }
   0xc   :  { %s534_s12 = smov 4  }
   0xd   :  { %59 = dma.hbm_to_vmem [thread:$0]  %s52_s7, 2048, %s54_s10, [#allocation9], %s533_s11, %s533_s11, %s534_s12  }
   0xe   :  { %521 = dma.done.wait [#allocation3], 64  }
   0xf   :  { %522 = vsyncadd [#allocation3], 4294967232 }
  0x10   :  { %523 = dma.done.wait [#allocation6], 160  }
  0x11   :  { %524 = vsyncadd [#allocation6], 4294967136 }
  0x12   :  { %525 = dma.done.wait [#allocation9], 2048  }
  0x13   :  { %526 = vsyncadd [#allocation9], 4294965248  ;;  %v80_v0 = vld [vmem:[#allocation5] sm:$0xff]  ;;  %vm96_vm0 = vcmask 1043456   ;;  %v79_v11 = vld [vmem:[#allocation2] sm:$0xf] }
  0x14   :  { %v384_v1 = vld [vmem:[#allocation8 + $0x38] sm:$0xff]  ;;  %v88_v2 = vunpack.c.l.b16 %v80_v0  ;;  %v89_v3 = vunpack.c.h.b16 %v80_v0  ;;  %v383_v7 = vld [vmem:[#allocation8 + $0x30] sm:$0xff]  ;;  %vm92_vm1 = vcmask 64512   ;;  %v382_v12 = vld [vmem:[#allocation8 + $0x28] sm:$0xff]  ;;  %s535_s13 = smov [#allocation10]   ;;  %s299_s17 = sshll.u32 %s589_s5, 4  ;;  %s300_s17 = int_to_ptr.hbm [resolvable:$true] %s299_s17 }
  0x15   :  { %v392_v4 = vld [vmem:[#allocation8 + $0x78] sm:$0xff]  ;;  %265 = vmatpush.bf16.msra.mxu2 %v384_v1  ;;  %v391_v8 = vld [vmem:[#allocation8 + $0x70] sm:$0xff]  ;;  %v390_v13 = vld [vmem:[#allocation8 + $0x68] sm:$0xff]  ;;  %s297_s14 = sshll.u32 %s535_s13, 4  ;;  %s298_s14 = int_to_ptr.vmem [resolvable:$true] %s297_s14 }
  0x16   :  { %v90_v5 = vpack.c.b16 %v88_v2, %v88_v2  ;;  %v91_v6 = vpack.c.b16 %v89_v3, %v89_v3  ;;  %278 = vmatpush.bf16.msra.mxu3 %v392_v4  ;;  %v381_v14 = vld [vmem:[#allocation8 + $0x20] sm:$0xff]  ;;  %v380_v16 = vld [vmem:[#allocation8 + $0x18] sm:$0xff]  ;;  %v379_v18 = vld [vmem:[#allocation8 + $0x10] sm:$0xff] }
  0x17   :  { %v389_v15 = vld [vmem:[#allocation8 + $0x60] sm:$0xff]  ;;  %v388_v17 = vld [vmem:[#allocation8 + $0x58] sm:$0xff]  ;;  %v387_v19 = vld [vmem:[#allocation8 + $0x50] sm:$0xff] }
  0x18   :  { %v98_v9 = vsel %vm96_vm0, %v90_v5, 0  ;;  %v101_v10 = vsel %vm96_vm0, %v91_v6, 0  ;;  %v378_v20 = vld [vmem:[#allocation8 + $0x8] sm:$0xff]  ;;  %v377_v22 = vld [vmem:[#allocation8] sm:$0xff]  ;;  %v81_v24 = vld [vmem:[#allocation7] sm:$0x3] }
  0x19   :  { %110 = vmatpush.bf16.msra.mxu0 %v98_v9  ;;  %123 = vmatpush.bf16.msra.mxu1 %v101_v10  ;;  %v386_v21 = vld [vmem:[#allocation8 + $0x48] sm:$0xff]  ;;  %v385_v23 = vld [vmem:[#allocation8 + $0x40] sm:$0xff]  ;;  %v83_v25 = vperm.slane %v81_v24, 0  ;;  %v84_v26 = vperm.slane %v81_v24, 1  ;;  %v400_v37 = vld [vmem:[%s588_s4] ss:$0 sm:$0xff] }
  0x1a   :  { %266 = vmatpush.bf16.msra.mxu2 %v383_v7  ;;  %279 = vmatpush.bf16.msra.mxu3 %v391_v8 }
  0x1c   :  { %311 = vmatmul.msk.bf16.vlgmr.msra.gmra.mxu0 %vm92_vm1, %v79_v11  ;;  %312 = vmatmul.msk.bf16.vlgmr.msra.gmra.mxu1 %vm92_vm1, %v79_v11 }
  0x1e   :  { %267 = vmatpush.bf16.msra.mxu2 %v382_v12  ;;  %280 = vmatpush.bf16.msra.mxu3 %v390_v13 }
  0x22   :  { %268 = vmatpush.bf16.msra.mxu2 %v381_v14  ;;  %281 = vmatpush.bf16.msra.mxu3 %v389_v15 }
  0x26   :  { %269 = vmatpush.bf16.msra.mxu2 %v380_v16  ;;  %282 = vmatpush.bf16.msra.mxu3 %v388_v17 }
  0x2a   :  { %270 = vmatpush.bf16.msra.mxu2 %v379_v18  ;;  %283 = vmatpush.bf16.msra.mxu3 %v387_v19 }
  0x2e   :  { %271 = vmatpush.bf16.msra.mxu2 %v378_v20  ;;  %284 = vmatpush.bf16.msra.mxu3 %v386_v21 }
  0x32   :  { %272 = vmatpush.bf16.msra.mxu2 %v377_v22  ;;  %285 = vmatpush.bf16.msra.mxu3 %v385_v23 }
  0x99   :  { %v112_v27 = vpop.f32.mrf.mxu0  ;;  %v125_v28 = vpop.f32.mrf.mxu1 }
  0x9a   :  { %v113_v29 = vadd.f32 %v112_v27, %v83_v25  ;;  %v126_v30 = vadd.f32 %v125_v28, %v84_v26 }
  0x9c   :  { %v129_v31 = vmax.f32 %v113_v29, 0.0  ;;  %v130_v32 = vmax.f32 %v126_v30, 0.0 }
  0x9e   :  { %v131_v33 = vpack.c.bf16 %v129_v31, %v129_v31  ;;  %v132_v34 = vpack.c.bf16 %v130_v32, %v130_v32 }
  0xa0   :  { %273 = vmatmul.bf16.vlgmr.msra.gmra.mxu2 %v131_v33  ;;  %286 = vmatmul.bf16.vlgmr.msra.gmra.mxu3 %v132_v34 }
  0xa1   :  { %v114_v35 = vpop.f32.mrf.mxu0  ;;  %v127_v36 = vpop.f32.mrf.mxu1 }
 0x123   :  { %v274_v38 = vpop.f32.mrf.mxu2  ;;  %v287_v39 = vpop.f32.mrf.mxu3 }
 0x124   :  { %v275_v40 = vadd.f32 %v400_v37, %v274_v38 }
 0x126   :  { %v288_v41 = vadd.f32 %v287_v39, %v275_v40 }
 0x128   :  { %291 = vst [vmem:[#allocation10] sm:$0xff] %v288_v41 }
 0x129   :  { %302 = dma.vmem_to_hbm [thread:$0]  %s298_s14, 128, %s300_s17, [#allocation4]  }
 0x12b   :  { %v276_v42 = vpop.f32.mrf.mxu2  ;;  %v289_v43 = vpop.f32.mrf.mxu3 }
 0x12c   :  { %527 = dma.done.wait [#allocation4], 128  }
 0x12d   :  { %528 = vsyncadd [#allocation4], 4294967168 }
 0x12e   :  { %307 = vsyncpa [#allocation3], 1 }
 0x12f   :  { %308 = vsyncpa [#allocation6], 1 }
 0x130   :  { %309 = vsyncpa [#allocation9], 1 }
 0x131   :  { %310 = vsyncpa [#allocation4], 1 }

</bundles_post_ra>
